<compile_context>
chip_gen: v7x
topology: tpu7x:2x2x1
jax: 0.10.0
libtpu: 0.0.40
codegen_flags: <defaults>
</compile_context>

<pallas_src>
import functools
import math

import jax
import jax.numpy as jnp
from jax.experimental import pallas as pl
from jax.experimental.pallas import tpu as pltpu


# ----------------------------- tiling helpers --------------------------------

_VMEM_BUDGET = 24 * 1024 * 1024      # used for tile sizing (conservative)
_VMEM_LIMIT = 48 * 1024 * 1024       # scoped VMEM limit (safe on v5e..v7x)
_STATS_TARGET_LANES = 32768          # amortizes the ~0.35 us per-grid-step cost
_REDUCE_TARGET_ROWS = 2048           # (2048, 128) f32 block = 1 MiB / buffer


def _round_up(x, m):
    return ((x + m - 1) // m) * m


def _stats_tile(hw, bytes_per_lane, target_lanes, vmem_budget):
    """Lane tile (multiple of 128) for the stats / fused pass.

    A cdiv grid is used, so the tile does NOT have to divide hw; the ragged
    tail is masked in-kernel.  The tile is re-balanced so the last (partial)
    block is not mostly padding.
    """
    cap = vmem_budget // max(bytes_per_lane, 1)
    lanes = max(128, (min(target_lanes, cap) // 128) * 128)
    lanes = min(lanes, _round_up(hw, 128))
    num_tiles = -(-hw // lanes)
    return _round_up(-(-hw // num_tiles), 128)


def _reduce_rows(rows_total, target_rows):
    """Sublane rows per reduce block: a multiple of 8 (dense (8,128) vregs)
    dividing rows_total, or the full dim when the array is small."""
    if rows_total <= target_rows:
        return rows_total            # full second-minor dim: always legal
    best = 0
    d = 8
    while d <= target_rows:
        if rows_total % d == 0:
            best = d
        d += 8
    return best if best else rows_total


# ----------------------------- in-kernel math ---------------------------------


def _softmax_nll(x, lbl):
    """x: (C, T) f32 logits, lbl: (1, T) int32 -> per-pixel NLL, shape (1, T)."""
    m = jnp.max(x, axis=0, keepdims=True)
    e = jnp.exp(x - m)
    s = jnp.sum(e, axis=0, keepdims=True)
    logz = m + jnp.log(s)                                       # log-sum-exp
    c_idx = jax.lax.broadcasted_iota(jnp.int32, x.shape, 0)     # (C, T)
    # select-and-reduce instead of materializing a (C, T) one-hot.
    # TODO(synk): labels >= C that are not ignore_index silently give
    # true_logit = 0 (nll = logZ) instead of erroring like CrossEntropyLoss.
    true_logit = jnp.sum(jnp.where(c_idx == lbl, x, 0.0), axis=0, keepdims=True)
    return jnp.maximum(logz - true_logit, 0.0)                  # -log p[true]


# ----------------------------- kernels ----------------------------------------


def _stats_kernel(x_ref, lbl_ref, out_ref, *, ignore_index, hw, tile):
    """Writes per-pixel nll; ignored / out-of-range (tail) pixels get -1.0."""
    x = x_ref[...].astype(jnp.float32)        # (C, T)
    lbl = lbl_ref[...]                        # (1, T)
    nll = _softmax_nll(x, lbl)                # (1, T)
    lane = jax.lax.broadcasted_iota(jnp.int32, lbl.shape, 1)
    pix_ok = (pl.program_id(1) * tile + lane) < hw     # ragged-tail mask
    ok = pix_ok & (lbl != ignore_index)
    out_ref[...] = jnp.where(ok, nll, jnp.float32(-1.0))


def _reduce_kernel(thr_ref, nll_ref, acc_ref):
    """Streaming masked reduction over dense (R, 128) nll blocks.

    acc_ref: (2, 128) per-sample, per-LANE partials (row 0: sum nll*kept,
    row 1: sum kept).  The final cross-lane reduce happens in JAX.
    """
    @pl.when(pl.program_id(1) == 0)
    def _():
        acc_ref[...] = jnp.zeros_like(acc_ref)

    thr = thr_ref[0]                          # SMEM scalar, loop-invariant
    nll = nll_ref[...]                        # (R, 128)
    kept = nll >= thr                         # sentinel -1 is never >= thr>=0
    acc_ref[0:1, :] += jnp.sum(jnp.where(kept, nll, 0.0), axis=0, keepdims=True)
    acc_ref[1:2, :] += jnp.sum(kept.astype(jnp.float32), axis=0, keepdims=True)


def _fused_kernel(x_ref, lbl_ref, acc_ref, *, ignore_index, nll_thresh, hw, tile):
    """Single pass for min_kept == 0: softmax nll + static threshold + reduce."""
    @pl.when(pl.program_id(1) == 0)
    def _():
        acc_ref[...] = jnp.zeros_like(acc_ref)

    x = x_ref[...].astype(jnp.float32)
    lbl = lbl_ref[...]
    nll = _softmax_nll(x, lbl)
    lane = jax.lax.broadcasted_iota(jnp.int32, lbl.shape, 1)
    pix_ok = (pl.program_id(1) * tile + lane) < hw
    kept = pix_ok & (lbl != ignore_index) & (nll >= nll_thresh)
    keptf = kept.astype(jnp.float32)
    # The logit read (C x T) dominates here, so the scalar cross-lane reduce is
    # hidden under the HBM DMA.
    acc_ref[0:1, :] += jnp.full((1, 128), jnp.sum(jnp.where(kept, nll, 0.0)),
                                jnp.float32)
    acc_ref[1:2, :] += jnp.full((1, 128), jnp.sum(keptf), jnp.float32)


# ----------------------------- wrapper -----------------------------------------


def ohem_cross_entropy_2d(predict, target, *, thresh=0.6, min_kept=0,
                          ignore_index=255, recall_target=0.95):
    """predict: (N, C, H, W) float, target: (N, H, W) int. Returns scalar loss."""
    n, c, h, w = predict.shape
    hw = h * w
    itemsize = jnp.dtype(predict.dtype).itemsize

    x = predict.reshape(n, c, hw)
    lbl = target.reshape(n, 1, hw).astype(jnp.int32)

    # Per-lane VMEM estimate: double-buffered logits + f32 temps + labels + out
    # (both (1, T) buffers are sublane-padded to 8 rows -> 32 B/lane each).
    bytes_per_lane = c * (2 * itemsize + 8) + 160
    tile = _stats_tile(hw, bytes_per_lane, _STATS_TARGET_LANES, _VMEM_BUDGET)
    num_tiles = -(-hw // tile)
    hw_pad = num_tiles * tile
    grid = (n, num_tiles)

    # Static threshold in nll space: prob <= thresh  <=>  nll >= -log(thresh).
    nll_thresh_static = float(-math.log(thresh)) if thresh > 0 else float("inf")

    # ---- single fused pass when the threshold is static (min_kept == 0) ----
    if min_kept <= 0:
        acc = pl.pallas_call(
            functools.partial(_fused_kernel, ignore_index=ignore_index,
                              nll_thresh=nll_thresh_static, hw=hw, tile=tile),
            out_shape=jax.ShapeDtypeStruct((n, 2, 128), jnp.float32),
            grid=grid,
            in_specs=[pl.BlockSpec((None, c, tile), lambda b, i: (b, 0, i)),
                      pl.BlockSpec((None, 1, tile), lambda b, i: (b, 0, i))],
            out_specs=pl.BlockSpec((None, 2, 128), lambda b, i: (b, 0, 0)),
            compiler_params=pltpu.CompilerParams(
                dimension_semantics=("parallel", "arbitrary"),
                vmem_limit_bytes=_VMEM_LIMIT),
        )(x, lbl)
        num = jnp.sum(acc[:, 0, 0])
        den = jnp.sum(acc[:, 1, 0])
        # TODO(synk): PyTorch would yield NaN when nothing is kept; we return 0.
        return jnp.where(den > 0, num / jnp.maximum(den, 1.0), jnp.float32(0.0))

    # ---- pass 1: per-pixel nll (nll-only stream; sentinel -1 for ignored) ----
    nll_map = pl.pallas_call(
        functools.partial(_stats_kernel, ignore_index=ignore_index,
                          hw=hw, tile=tile),
        out_shape=jax.ShapeDtypeStruct((n, 1, hw_pad), jnp.float32),
        grid=grid,
        in_specs=[pl.BlockSpec((None, c, tile), lambda b, i: (b, 0, i)),
                  pl.BlockSpec((None, 1, tile), lambda b, i: (b, 0, i))],
        out_specs=pl.BlockSpec((None, 1, tile), lambda b, i: (b, 0, i)),
        compiler_params=pltpu.CompilerParams(
            dimension_semantics=("parallel", "parallel"),
            vmem_limit_bytes=_VMEM_LIMIT),
    )(x, lbl)

    # ---- OHEM threshold (glue): kth-LARGEST nll via per-sample approx top-k
    #      + tiny exact merge; no full sort of the N*HW vector. ----
    num_valid = jnp.sum((target != ignore_index).astype(jnp.int32))
    kk = int(min(min_kept, hw_pad))
    vals, _ = jax.lax.approx_max_k(nll_map, kk, reduction_dimension=-1,
                                   recall_target=recall_target)
    pool = vals.reshape(-1)                               # (n * kk,), tiny
    k2 = int(min(min_kept, pool.size))
    top, _ = jax.lax.top_k(pool, k2)
    kth = top[k2 - 1]                                     # kth-largest nll

    thr = jnp.minimum(kth, jnp.float32(nll_thresh_static))   # = -log(max(p_k, thresh))
    # Selection only when num_valid > min_kept (matches the PyTorch branching);
    # otherwise keep every valid pixel (nll >= 0).  Clamping to 0 also makes
    # sure the -1 sentinel (ignored / padded pixels) can never be kept.
    thr = jnp.where(num_valid > min_kept, thr, jnp.float32(0.0))
    thr = jnp.maximum(thr, jnp.float32(0.0))
    thr_arr = thr.reshape(1).astype(jnp.float32)

    # ---- pass 2: streaming masked reduction over dense (R, 128) blocks ----
    rows_total = hw_pad // 128
    nll_rows = nll_map.reshape(n, rows_total, 128)
    rrows = _reduce_rows(rows_total, _REDUCE_TARGET_ROWS)
    grid_r = (n, rows_total // rrows)
    acc = pl.pallas_call(
        _reduce_kernel,
        out_shape=jax.ShapeDtypeStruct((n, 2, 128), jnp.float32),
        grid=grid_r,
        in_specs=[pl.BlockSpec(memory_space=pltpu.MemorySpace.SMEM),
                  pl.BlockSpec((None, rrows, 128), lambda b, i: (b, i, 0))],
        out_specs=pl.BlockSpec((None, 2, 128), lambda b, i: (b, 0, 0)),
        compiler_params=pltpu.CompilerParams(
            dimension_semantics=("parallel", "arbitrary"),
            vmem_limit_bytes=_VMEM_LIMIT),
    )(thr_arr, nll_rows)

    num = jnp.sum(acc[:, 0, :])
    den = jnp.sum(acc[:, 1, :])
    # TODO(synk): PyTorch would yield NaN when nothing is kept; we return 0.
    return jnp.where(den > 0, num / jnp.maximum(den, 1.0), jnp.float32(0.0))


# ----------------------------- reference & demo --------------------------------


def _reference_loss(predict, target, thresh, min_kept, ignore_index):
    """Plain-JAX mirror of the OHEM forward (exact kth, for a sanity check)."""
    n, c, h, w = predict.shape
    x = jnp.moveaxis(predict, 1, 0).reshape(c, -1).astype(jnp.float32)
    lbl = target.reshape(-1)
    valid = lbl != ignore_index
    logz = jax.nn.logsumexp(x, axis=0)
    true_logit = x[jnp.clip(lbl, 0, c - 1), jnp.arange(x.shape[1])]
    nll = jnp.maximum(logz - true_logit, 0.0)
    nll_masked = jnp.where(valid, nll, -1.0)
    num_valid = jnp.sum(valid.astype(jnp.int32))
    static_thr = jnp.float32(-math.log(thresh)) if thresh > 0 else jnp.float32(jnp.inf)
    if min_kept > 0:
        srt = jnp.sort(nll_masked)[::-1]
        kth = srt[min(min_kept, nll_masked.size) - 1]
        thr = jnp.minimum(kth, static_thr)
    else:
        thr = static_thr
    thr = jnp.where(num_valid > min_kept, thr, jnp.float32(0.0))
    thr = jnp.maximum(thr, jnp.float32(0.0))
    kept = valid & (nll >= thr)
    den = jnp.sum(kept.astype(jnp.float32))
    num = jnp.sum(jnp.where(kept, nll, 0.0))
    return jnp.where(den > 0, num / jnp.maximum(den, 1.0), jnp.float32(0.0))


if __name__ == "__main__":
    key = jax.random.PRNGKey(0)
    kx, kt, km, kn = jax.random.split(key, 4)

    n, c, h, w = 2, 8, 16, 16
    clean = jax.random.randint(kt, (n, h, w), 0, c, dtype=jnp.int32)
    ignore_mask = jax.random.bernoulli(km, 0.1, (n, h, w))
    target = jnp.where(ignore_mask, 255, clean)

    # Case A/B: random logits (static threshold dominates the OHEM min).
    predict = jax.random.normal(kx, (n, c, h, w), dtype=jnp.float32)
    # Case C: mostly-correct confident logits -> the dynamic (kth-nll)
    # threshold is the active one, exercising the top-k path for real.
    predict_easy = (4.0 * jnp.moveaxis(jax.nn.one_hot(clean, c, dtype=jnp.float32), -1, 1)
                    + 0.5 * jax.random.normal(kn, (n, c, h, w), dtype=jnp.float32))

    loss_fused = ohem_cross_entropy_2d(predict, target, thresh=0.6, min_kept=0,
                                       ignore_index=255)
    loss_topk = ohem_cross_entropy_2d(predict, target, thresh=0.6, min_kept=64,
                                      ignore_index=255)
    loss_hard = ohem_cross_entropy_2d(predict_easy, target, thresh=0.6,
                                      min_kept=64, ignore_index=255)
    loss_fused, loss_topk, loss_hard = jax.block_until_ready(
        (loss_fused, loss_topk, loss_hard))

    assert bool(jnp.isfinite(loss_fused)), "min_kept=0 loss is not finite"
    assert bool(jnp.isfinite(loss_topk)), "min_kept>0 loss is not finite"
    assert bool(jnp.isfinite(loss_hard)), "hard-mining loss is not finite"

    ref_fused = _reference_loss(predict, target, 0.6, 0, 255)
    ref_topk = _reference_loss(predict, target, 0.6, 64, 255)
    ref_hard = _reference_loss(predict_easy, target, 0.6, 64, 255)
    assert bool(jnp.allclose(loss_fused, ref_fused, rtol=1e-2, atol=1e-2)), (
        loss_fused, ref_fused)
    assert bool(jnp.allclose(loss_topk, ref_topk, rtol=1e-2, atol=1e-2)), (
        loss_topk, ref_topk)
    assert bool(jnp.allclose(loss_hard, ref_hard, rtol=2e-2, atol=2e-2)), (
        loss_hard, ref_hard)

    print("KERNEL_OK")
</pallas_src>

<mosaic_0001>
module attributes {stable_mosaic.version = 11 : i64} {
  func.func @_fused_kernel(%arg0: i32, %arg1: i32, %arg2: memref<1x8x256xf32, #tpu.memory_space<vmem>>, %arg3: memref<1x1x256xi32, #tpu.memory_space<vmem>>, %arg4: memref<1x2x128xf32, #tpu.memory_space<vmem>>) attributes {dimension_semantics = [#tpu.dimension_semantics<parallel>, #tpu.dimension_semantics<arbitrary>], iteration_bounds = array<i64: 2, 1>, scalar_prefetch = 0 : i64, scratch_operands = 0 : i64, tpu.core_type = #tpu.core_type<tc>, window_params = [{transform_indices = @transform_0, window_bounds = array<i64: 1, 8, 256>}, {transform_indices = @transform_1, window_bounds = array<i64: 1, 1, 256>}, {transform_indices = @transform_2, window_bounds = array<i64: 1, 2, 128>}]} {
    %c0_i32 = arith.constant 0 : i32
    %0 = arith.cmpi eq, %arg1, %c0_i32 : i32
    %1 = arith.extui %0 : i1 to i32
    %c0_i32_0 = arith.constant 0 : i32
    %2 = arith.cmpi ne, %1, %c0_i32_0 : i32
    scf.if %2 {
      %cst_26 = arith.constant 0.000000e+00 : f32
      %64 = vector.broadcast %cst_26 : f32 to vector<2x128xf32>
      %c0_27 = arith.constant 0 : index
      %c0_28 = arith.constant 0 : index
      %c0_29 = arith.constant 0 : index
      %65 = vector.load %arg4[%c0_27, %c0_28, %c0_29] : memref<1x2x128xf32, #tpu.memory_space<vmem>>, vector<1x2x128xf32>
      %66 = vector.shape_cast %65 : vector<1x2x128xf32> to vector<2x128xf32>
      %67 = vector.shape_cast %64 : vector<2x128xf32> to vector<1x2x128xf32>
      tpu.vector_store %arg4[%c0_27, %c0_28, %c0_29], %67 {strides = array<i32>} : memref<1x2x128xf32, #tpu.memory_space<vmem>>, vector<1x2x128xf32>,
    } else {
    }
    %c0 = arith.constant 0 : index
    %c0_1 = arith.constant 0 : index
    %c0_2 = arith.constant 0 : index
    %3 = vector.load %arg2[%c0, %c0_1, %c0_2] : memref<1x8x256xf32, #tpu.memory_space<vmem>>, vector<1x8x256xf32>
    %4 = vector.shape_cast %3 : vector<1x8x256xf32> to vector<8x256xf32>
    %c0_3 = arith.constant 0 : index
    %c0_4 = arith.constant 0 : index
    %c0_5 = arith.constant 0 : index
    %5 = vector.load %arg3[%c0_3, %c0_4, %c0_5] : memref<1x1x256xi32, #tpu.memory_space<vmem>>, vector<1x1x256xi32>
    %6 = vector.shape_cast %5 : vector<1x1x256xi32> to vector<1x256xi32>
    %cst = arith.constant dense<0xFF800000> : vector<256xf32>
    %7 = vector.multi_reduction <maximumf>, %4, %cst [0] : vector<8x256xf32> to vector<256xf32>
    %8 = vector.shape_cast %7 : vector<256xf32> to vector<1x256xf32>
    %9 = vector.broadcast %8 : vector<1x256xf32> to vector<8x256xf32>
    %10 = arith.subf %4, %9 : vector<8x256xf32>
    %11 = math.exp %10 : vector<8x256xf32>
    %cst_6 = arith.constant dense<0.000000e+00> : vector<256xf32>
    %12 = vector.multi_reduction <add>, %11, %cst_6 [0] : vector<8x256xf32> to vector<256xf32>
    %13 = vector.shape_cast %12 : vector<256xf32> to vector<1x256xf32>
    %14 = math.log %13 : vector<1x256xf32>
    %15 = arith.addf %8, %14 : vector<1x256xf32>
    %16 = tpu.iota {dimensions = array<i32: 0>} : vector<8x256xi32>
    %17 = vector.broadcast %6 : vector<1x256xi32> to vector<8x256xi32>
    %18 = arith.cmpi eq, %16, %17 : vector<8x256xi32>
    %cst_7 = arith.constant 0.000000e+00 : f32
    %19 = vector.broadcast %cst_7 : f32 to vector<8x256xf32>
    %20 = arith.select %18, %4, %19 : vector<8x256xi1>, vector<8x256xf32>
    %cst_8 = arith.constant dense<0.000000e+00> : vector<256xf32>
    %21 = vector.multi_reduction <add>, %20, %cst_8 [0] : vector<8x256xf32> to vector<256xf32>
    %22 = vector.shape_cast %21 : vector<256xf32> to vector<1x256xf32>
    %23 = arith.subf %15, %22 : vector<1x256xf32>
    %cst_9 = arith.constant 0.000000e+00 : f32
    %24 = vector.broadcast %cst_9 : f32 to vector<1x256xf32>
    %25 = arith.maximumf %23, %24 : vector<1x256xf32>
    %26 = tpu.iota {dimensions = array<i32: 1>} : vector<1x256xi32>
    %c256_i32 = arith.constant 256 : i32
    %27 = arith.muli %arg1, %c256_i32 : i32
    %28 = vector.broadcast %27 : i32 to vector<1x256xi32>
    %29 = arith.addi %28, %26 : vector<1x256xi32>
    %c256_i32_10 = arith.constant 256 : i32
    %30 = vector.broadcast %c256_i32_10 : i32 to vector<1x256xi32>
    %31 = arith.cmpi slt, %29, %30 : vector<1x256xi32>
    %c255_i32 = arith.constant 255 : i32
    %32 = vector.broadcast %c255_i32 : i32 to vector<1x256xi32>
    %33 = arith.cmpi ne, %6, %32 : vector<1x256xi32>
    %34 = arith.andi %31, %33 : vector<1x256xi1>
    %cst_11 = arith.constant 0.510825634 : f32
    %35 = vector.broadcast %cst_11 : f32 to vector<1x256xf32>
    %36 = arith.cmpf oge, %25, %35 : vector<1x256xf32>
    %37 = arith.andi %34, %36 : vector<1x256xi1>
    %38 = arith.extui %37 : vector<1x256xi1> to vector<1x256xi32>
    %39 = arith.sitofp %38 : vector<1x256xi32> to vector<1x256xf32>
    %c0_12 = arith.constant 0 : index
    %c0_13 = arith.constant 0 : index
    %c0_14 = arith.constant 0 : index
    %40 = vector.load %arg4[%c0_12, %c0_13, %c0_14] : memref<1x2x128xf32, #tpu.memory_space<vmem>>, vector<1x1x128xf32>
    %41 = vector.shape_cast %40 : vector<1x1x128xf32> to vector<1x128xf32>
    %cst_15 = arith.constant 0.000000e+00 : f32
    %42 = vector.broadcast %cst_15 : f32 to vector<1x256xf32>
    %43 = arith.select %37, %25, %42 : vector<1x256xi1>, vector<1x256xf32>
    %44 = vector.shape_cast %43 : vector<1x256xf32> to vector<1x1x256xf32>
    %cst_16 = arith.constant dense<0.000000e+00> : vector<1xf32>
    %45 = vector.multi_reduction <add>, %44, %cst_16 [1, 2] : vector<1x1x256xf32> to vector<1xf32>
    %46 = vector.shape_cast %45 : vector<1xf32> to vector<1x1x1xf32>
    %47 = vector.extract %46[0, 0, 0] : f32 from vector<1x1x1xf32>
    %48 = vector.broadcast %47 : f32 to vector<1x128xf32>
    %49 = arith.addf %41, %48 : vector<1x128xf32>
    %c0_17 = arith.constant 0 : index
    %c0_18 = arith.constant 0 : index
    %c0_19 = arith.constant 0 : index
    %50 = vector.load %arg4[%c0_17, %c0_18, %c0_19] : memref<1x2x128xf32, #tpu.memory_space<vmem>>, vector<1x1x128xf32>
    %51 = vector.shape_cast %50 : vector<1x1x128xf32> to vector<1x128xf32>
    %52 = vector.shape_cast %49 : vector<1x128xf32> to vector<1x1x128xf32>
    tpu.vector_store %arg4[%c0_17, %c0_18, %c0_19], %52 {strides = array<i32>} : memref<1x2x128xf32, #tpu.memory_space<vmem>>, vector<1x1x128xf32>,
    %c0_20 = arith.constant 0 : index
    %c1 = arith.constant 1 : index
    %c0_21 = arith.constant 0 : index
    %53 = vector.load %arg4[%c0_20, %c1, %c0_21] : memref<1x2x128xf32, #tpu.memory_space<vmem>>, vector<1x1x128xf32>
    %54 = vector.shape_cast %53 : vector<1x1x128xf32> to vector<1x128xf32>
    %55 = vector.shape_cast %39 : vector<1x256xf32> to vector<1x1x256xf32>
    %cst_22 = arith.constant dense<0.000000e+00> : vector<1xf32>
    %56 = vector.multi_reduction <add>, %55, %cst_22 [1, 2] : vector<1x1x256xf32> to vector<1xf32>
    %57 = vector.shape_cast %56 : vector<1xf32> to vector<1x1x1xf32>
    %58 = vector.extract %57[0, 0, 0] : f32 from vector<1x1x1xf32>
    %59 = vector.broadcast %58 : f32 to vector<1x128xf32>
    %60 = arith.addf %54, %59 : vector<1x128xf32>
    %c0_23 = arith.constant 0 : index
    %c1_24 = arith.constant 1 : index
    %c0_25 = arith.constant 0 : index
    %61 = vector.load %arg4[%c0_23, %c1_24, %c0_25] : memref<1x2x128xf32, #tpu.memory_space<vmem>>, vector<1x1x128xf32>
    %62 = vector.shape_cast %61 : vector<1x1x128xf32> to vector<1x128xf32>
    %63 = vector.shape_cast %60 : vector<1x128xf32> to vector<1x1x128xf32>
    tpu.vector_store %arg4[%c0_23, %c1_24, %c0_25], %63 {strides = array<i32>} : memref<1x2x128xf32, #tpu.memory_space<vmem>>, vector<1x1x128xf32>,
    return
  }
  func.func @transform_0(%arg0: i32, %arg1: i32) -> (i32, i32, i32) {
    %c0_i32 = arith.constant 0 : i32
    %c0_i32_0 = arith.constant 0 : i32
    return %arg0, %c0_i32, %arg1 : i32, i32, i32
  }
  func.func @transform_1(%arg0: i32, %arg1: i32) -> (i32, i32, i32) {
    %c0_i32 = arith.constant 0 : i32
    %c0_i32_0 = arith.constant 0 : i32
    return %arg0, %c0_i32, %arg1 : i32, i32, i32
  }
  func.func @transform_2(%arg0: i32, %arg1: i32) -> (i32, i32, i32) {
    %c0_i32 = arith.constant 0 : i32
    %c0_i32_0 = arith.constant 0 : i32
    %c0_i32_1 = arith.constant 0 : i32
    return %arg0, %c0_i32, %c0_i32_0 : i32, i32, i32
  }
}

</mosaic_0001>

<bundles_post_ra>
// kernel: tpu_custom_call.1
= control target key start
LH: loop header
LB: loop body
LE: loop exit
PB: predicated region body
PF: predicated region fallthrough
CT: control target
= control target key end

     0   :  { %7 = vsyncpa [#allocation3], 0  ;;  %s978_s0 = inlined_call_operand.hbm [shape: f32[2,8,256], index: 0, kind: input, shape index: {}]   ;;  %s979_s1 = inlined_call_operand.hbm [shape: s32[2,1,256], index: 1, kind: input, shape index: {}]   ;;  %s980_s2 = inlined_call_operand.hbm [shape: f32[2,2,128], index: 2, kind: output, shape index: {}]  }
   0x1   :  { %9 = vsyncpa [#allocation3 + $0x1], 0 }
   0x2   :  { %10 = vsyncpa [#allocation6], 0 }
   0x3   :  { %12 = vsyncpa [#allocation6 + $0x1], 0 }
   0x4   :  { %13 = vsyncpa [#allocation4], 0 }
   0x5   :  { %15 = vsyncpa [#allocation4 + $0x1], 0  ;;  %s752_s9 = smov 0   ;;  %s754_s10 = smov 0  }
   0x6   :  { %s756_s11 = smov 0   ;;  %s758_s12 = smov 0  }
   0x7   :  { %s760_s13 = smov 0   ;;  %s762_s14 = smov 0  }
   0x8 LB: > { %s481_s15 = sadd.s32 4294967295, %s730_s14   ;;  %s482_s16 = sadd.s32 4294967294, %s730_s14   ;;  %s730_s14 = sphi %s762_s14, %s21_s14   ;;  %s726_s13 = sphi %s760_s13, %s1000_s13   ;;  %s722_s12 = sphi %s758_s12, %s999_s12   ;;  %s718_s11 = sphi %s756_s11, %s998_s11   ;;  %s714_s10 = sphi %s754_s10, %s997_s10   ;;  %s710_s9 = sphi %s752_s9, %s996_s9  }
   0x9   : > { %s33_s17 = sadd.s32 1, %s726_s13  ;;  %s42_s18 = sadd.s32 1, %s718_s11 }
   0xa   : > { %p35_p0 = scmp.ge.s32.totalorder %s33_s17, 2  ;;  %p49_p1 = scmp.ne.s32.totalorder %s718_s11, %s714_s10 }
   0xb   : > { %p50_p2 = scmp.eq.s32.totalorder %s730_s14, 0  ;;  %p55_p3 = scmp.ne.s32.totalorder %s714_s10, %s710_s9 }
   0xc   : > { %s1002_s17 = smov (%p35_p0, %s33_s17), 0  ;;  %p56_p5 = scmp.eq.s32.totalorder %s481_s15, 0 }
   0xd   : > { %p793_p4 = por %p50_p2, %p49_p1  ;;  %s37_s20 = ssub.s32 %s726_s13, %s1002_s17 }
   0xe   : > { %p107_p6 = scmp.eq.s32.totalorder %s481_s15, 1  ;;  %p40_p7 = scmp.eq.s32.totalorder %s37_s20, 0 }
   0xf   : > { %p799_p8 = por %p56_p5, %p55_p3  ;;  %p113_p10 = scmp.eq.s32.totalorder %s482_s16, 1 }
  0x10   : > { %p803_p9 = por %p107_p6, %p49_p1  ;;  %p524_p13 = scmp.lt.s32.totalorder %s730_s14, 2 }
  0x11   : > { %s984_s21 = scalar_select %p799_p8, 1, 0 }
  0x12   : > { %s985_s22 = scalar_select %p803_p9, 1, 0 }
  0x13   : > { %s808_s23 = scalar_select %p40_p7, %s718_s11, %s42_s18  }
  0x14   : > { %p810_p11 = por %p113_p10, %p55_p3  ;;  %s817_s25 = sand.u32 1, %s718_s11  }
  0x15   : > { %s485_s26 = sshll.u32 %s817_s25, 4  ;;  %s501_s27 = sshll.u32 %s726_s13, 8 }
  0x16   : > { %s986_s24 = scalar_select %p810_p11, 1, 0 }
  0x17   : > { %s824_s30 = scalar_lea.hbm %s978_s0, %s501_s27  ;;  %s137_s3 = scalar_lea.vmem [#allocation2], %s485_s26 }
  0x18   : > { %s147_s4 = sshll.u32 %s137_s3, 4  ;;  %p830_p0 = pnand %p524_p13, %p793_p4  ;;  %s826_s4 = int_to_ptr.vmem [resolvable:$true] %s147_s4 }
  0x19   : > { %s134_s6 = scalar_lea.sflag [#allocation3], %s817_s25  ;;  %s584_s7 = scalar_lea.hbm %s824_s30, 256 }
  0x1a   : > { %p585_p3 = scmp.ne.s32.totalorder %s824_s30, %s584_s7  ;;  %p586_p5 = pneg %p830_p0 }
  0x1b   : > { %s589_s16 = scalar_lea.hbm %s978_s0, 512  ;;  %p590_p4 = scmp.lt.u32.totalorder %s824_s30, %s978_s0 }
  0x1c   : > { %p587_p6 = pnand %p586_p5, %p585_p3  ;;  %p591_p10 = scmp.lt.u32.totalorder %s589_s16, %s584_s7 }
  0x1d   : > { %p593_p12 = scmp.lt.u32.totalorder %s584_s7, %s824_s30 }
  0x1e   : > { %p588_p7 = pneg %p587_p6  ;;  %p592_p13 = por %p591_p10, %p590_p4 }
  0x20   : > { %p594_p1 = por %p593_p12, %p592_p13 }
  0x22   : > { %p595_p2 = pnand %p594_p1, %p588_p7 }
  0x24   : > { %598 = shalt.err (!%p595_p2)
}
  0x25   : > { %s599_s20 = scalar_lea.vmem %s826_s4, 256  ;;  %s732_s26 = smov [#allocation2]  }
  0x26   : > { %p600_p3 = scmp.ne.s32.totalorder %s826_s4, %s599_s20  ;;  %s604_s27 = sshll.u32 %s732_s26, 4  ;;  %s605_s27 = int_to_ptr.vmem [resolvable:$false] %s604_s27 }
  0x27   : > { %s606_s28 = scalar_lea.vmem %s605_s27, 512  ;;  %p607_p9 = scmp.lt.s32.totalorder %s826_s4, %s605_s27 }
  0x28   : > { %p602_p6 = pnand %p600_p3, %p586_p5  ;;  %p608_p4 = scmp.lt.s32.totalorder %s606_s28, %s599_s20 }
  0x2a   : > { %p603_p11 = pneg %p602_p6  ;;  %p609_p10 = por %p608_p4, %p607_p9 }
  0x2c   : > { %p610_p12 = pnand %p609_p10, %p603_p11 }
  0x2e   : > { %613 = shalt.err (!%p610_p12)
}
  0x2f   : > { %516 = dma.hbm_to_vmem [thread:$0]  (!%p830_p0), %s824_s30, 256, %s826_s4, %s134_s6  }
  0x30   : > { %p988_p1 = scmp.lt.s32.totalorder %s730_s14, 3  ;;  %p989_p2 = scmp.ge.s32.totalorder %s730_s14, 1 }
  0x31   : > { %s488_s3 = sshll.u32 %s817_s25, 1  ;;  %s502_s7 = sshll.u32 %s726_s13, 5 }
  0x32   : > { %p866_p7 = pnand %p989_p2, %p988_p1  ;;  %s875_s16 = scalar_lea.hbm %s979_s1, %s502_s7 }
  0x33   : > { %s158_s18 = scalar_lea.vmem [#allocation5], %s488_s3  ;;  %s155_s30 = scalar_lea.sflag [#allocation6], %s817_s25 }
  0x34   : > { %s990_s29 = scalar_select %p866_p7, 1, 0 }
  0x35   : > { %s168_s19 = sshll.u32 %s158_s18, 4  ;;  %s614_s4 = scalar_lea.hbm %s875_s16, 32  ;;  %s169_s19 = int_to_ptr.vmem [resolvable:$true] %s168_s19 }
  0x36   : > { %p615_p9 = scmp.ne.s32.totalorder %s875_s16, %s614_s4  ;;  %s619_s26 = scalar_lea.hbm %s979_s1, 64 }
  0x37   : > { %p620_p3 = scmp.lt.u32.totalorder %s875_s16, %s979_s1  ;;  %p621_p6 = scmp.lt.u32.totalorder %s619_s26, %s614_s4 }
  0x38   : > { %p617_p11 = pnand %p615_p9, %p586_p5  ;;  %p623_p10 = scmp.lt.u32.totalorder %s614_s4, %s875_s16 }
  0x39   : > { %p622_p4 = por %p621_p6, %p620_p3 }
  0x3a   : > { %p618_p13 = pneg %p617_p11 }
  0x3b   : > { %p624_p12 = por %p623_p10, %p622_p4 }
  0x3d   : > { %p625_p1 = pnand %p624_p12, %p618_p13 }
  0x3f   : > { %628 = shalt.err (!%p625_p1)
}
  0x40   : > { %s629_s25 = scalar_lea.vmem %s169_s19, 32  ;;  %s733_s3 = smov [#allocation5]  }
  0x41   : > { %p630_p2 = scmp.ne.s32.totalorder %s169_s19, %s629_s25  ;;  %s634_s7 = sshll.u32 %s733_s3, 4  ;;  %s635_s7 = int_to_ptr.vmem [resolvable:$false] %s634_s7 }
  0x42   : > { %s636_s8 = scalar_lea.vmem %s635_s7, 64  ;;  %p637_p8 = scmp.lt.s32.totalorder %s169_s19, %s635_s7 }
  0x43   : > { %p632_p9 = pnand %p630_p2, %p586_p5  ;;  %p638_p7 = scmp.lt.s32.totalorder %s636_s8, %s629_s25 }
  0x45   : > { %p633_p11 = pneg %p632_p9  ;;  %p639_p3 = por %p638_p7, %p637_p8 }
  0x47   : > { %p640_p6 = pnand %p639_p3, %p633_p11 }
  0x49   : > { %643 = shalt.err (!%p640_p6)
}
  0x4a   : > { %519 = dma.hbm_to_vmem [thread:$0]  (!%p830_p0), %s875_s16, 32, %s169_s19, %s155_s30  }
  0x4b   : > { %p991_p13 = scmp.ne.s32.totalorder %s990_s29, 0 }
  0x4c   : > { %s900_s15 = sand.u32 (!%p991_p13), 1, %s714_s10   ;;  %p992_p5 = scmp.ne.s32.totalorder (!%p991_p13), %s984_s21, 0 }
  0x4d   : > { %177 = sbr.rel (%p991_p13) target bundleno = 379 (0x17b), region = 28  ;;  %s492_s18 = sshll.u32 (!%p991_p13), %s900_s15, 4 }
  0x4e   : > { %s180_s4 = scalar_lea.sflag (!%p991_p13), [#allocation3], %s900_s15  ;;  %s183_s6 = scalar_lea.vmem (!%p991_p13), [#allocation2], %s492_s18 }
  0x54   : > { %697 = dma.done.wait (%p992_p5), %s180_s4, 256  }
  0x55   : > { %699 = vsyncadd (%p992_p5), %s180_s4, 4294967040  ;;  %s493_s5 = sshll.u32 %s900_s15, 1  ;;  %s189_s29 = scalar_lea.sflag [#allocation6], %s900_s15 }
  0x56   : > { %s192_s16 = scalar_lea.vmem [#allocation5], %s493_s5 }
  0x57   : > { %701 = dma.done.wait (%p992_p5), %s189_s29, 32  }
  0x58   : > { %703 = vsyncadd (%p992_p5), %s189_s29, 4294967264  ;;  %s914_s19 = scalar_lea.vmem [#allocation7], %s493_s5  ;;  %v734_v0 = vmov 0.0   ;;  %v225_v1 = vld [vmem:[%s183_s6] sm:$0xff]  ;;  %v226_v2 = vld [vmem:[%s183_s6 + $0x8] sm:$0xff]  ;;  %v264_v13 = vlaneseq  ;;  %v735_v53 = vmov 0  }
  0x59   : > { %224 = vst [vmem:[%s914_s19] sm:$0x3] %v734_v0  ;;  %v228_v3 = vrot.slane %v225_v1, 4  ;;  %v234_v4 = vrot.slane %v226_v2, 4  ;;  %v227_v22 = vld [vmem:[%s192_s16] sm:$0x3]  ;;  %vm328_vm6 = vcmask 1040384  }
  0x5a   : > { %v265_v18 = vshrl.u32 %v264_v13, 7  ;;  %vm303_vm2 = vcmp.ne.s32.totalorder %v227_v22, 255  ;;  %s498_s30 = sshll.u32 %s722_s12, 5  ;;  %s374_s20 = sshll.u32 %s914_s19, 4  ;;  %s930_s20 = int_to_ptr.vmem [resolvable:$true] %s374_s20 }
  0x5b   : > { %v229_v5 = vmax.f32 %v225_v1, %v228_v3  ;;  %v235_v6 = vmax.f32 %v226_v2, %v234_v4  ;;  %v304_v54 = vsel %vm303_vm2, 1, %v735_v53  ;;  %s928_s25 = scalar_lea.hbm %s980_s2, %s498_s30  ;;  %s361_s3 = scalar_lea.sflag [#allocation4], %s900_s15 }
  0x5c   : > { %v268_v21 = vsub.s32 0, %v265_v18  ;;  %v272_v23 = vsub.s32 1, %v265_v18  ;;  %s644_s7 = scalar_lea.vmem %s930_s20, 32  ;;  %p993_p0 = scmp.ne.s32.totalorder %s985_s22, 0 }
  0x5d   : > { %v230_v7 = vrot.slane %v229_v5, 2  ;;  %v236_v8 = vrot.slane %v235_v6, 2  ;;  %p645_p8 = scmp.ne.s32.totalorder %s930_s20, %s644_s7  ;;  %s736_s12 = smov [#allocation7]  }
  0x5e   : > { %v269_v24 = vrot.slane %v227_v22, %v268_v21  ;;  %v273_v25 = vrot.slane %v227_v22, %v272_v23  ;;  %v308_v61 = vrot.slane %v304_v54, %v268_v21  ;;  %v312_v63 = vrot.slane %v304_v54, %v272_v23  ;;  %s648_s8 = sshll.u32 %s736_s12, 4  ;;  %s649_s8 = int_to_ptr.vmem [resolvable:$false] %s648_s8 }
  0x5f   : > { %v231_v9 = vmax.f32 %v229_v5, %v230_v7  ;;  %v237_v10 = vmax.f32 %v235_v6, %v236_v8  ;;  %p646_p7 = pnand %p645_p8, %p993_p0  ;;  %s650_s18 = scalar_lea.vmem %s649_s8, 64 }
  0x60   : > { %vm274_vm0 = vcmp.eq.s32.totalorder %v265_v18, %v269_v24  ;;  %vm275_vm1 = vcmp.eq.s32.totalorder %v265_v18, %v273_v25  ;;  %vm313_vm3 = vcmp.ne.s32.totalorder %v308_v61, 0  ;;  %vm314_vm4 = vcmp.ne.s32.totalorder %v312_v63, 0  ;;  %p651_p10 = scmp.lt.s32.totalorder %s930_s20, %s649_s8  ;;  %p652_p12 = scmp.lt.s32.totalorder %s650_s18, %s644_s7 }
  0x61   : > { %v232_v11 = vrot.slane %v231_v9, 1  ;;  %v238_v12 = vrot.slane %v237_v10, 1  ;;  %v276_v29 = vsel %vm274_vm0, %v225_v1, 0.0  ;;  %v277_v31 = vsel %vm275_vm1, %v226_v2, 0.0  ;;  %p647_p4 = pneg %p646_p7 }
  0x62   : > { %v278_v34 = vrot.slane %v276_v29, 4  ;;  %v284_v36 = vrot.slane %v277_v31, 4  ;;  %p653_p1 = por %p652_p12, %p651_p10 }
  0x63   : > { %v233_v14 = vmax.f32 %v231_v9, %v232_v11  ;;  %v239_v15 = vmax.f32 %v237_v10, %v238_v12 }
  0x64   : > { %v279_v40 = vadd.f32 %v278_v34, %v276_v29  ;;  %v285_v42 = vadd.f32 %v284_v36, %v277_v31  ;;  %v344_v31 = vld [vmem:[%s914_s19 + $0x1] sm:$0x1]  ;;  %p654_p2 = pnand %p653_p1, %p647_p4 }
  0x65   : > { %v240_v16 = vsub.f32 %v225_v1, %v233_v14  ;;  %v241_v17 = vsub.f32 %v226_v2, %v239_v15 }
  0x66   : > { %v280_v46 = vrot.slane %v279_v40, 2  ;;  %v286_v47 = vrot.slane %v285_v42, 2 }
  0x67   : > { %v242_v19 = vmul.f32 1.442695, %v240_v16  ;;  %v244_v20 = vmul.f32 1.442695, %v241_v17 }
  0x68   : > { %v281_v48 = vadd.f32 %v280_v46, %v279_v40  ;;  %v287_v49 = vadd.f32 %v286_v47, %v285_v42 }
  0x69   : > { %576 = vpow2.f32 %v242_v19 }
  0x6a   : > { %578 = vpow2.f32 %v244_v20  ;;  %v282_v50 = vrot.slane %v281_v48, 1  ;;  %v288_v51 = vrot.slane %v287_v49, 1 }
  0x6c   : > { %v283_v57 = vadd.f32 %v282_v50, %v281_v48  ;;  %v289_v59 = vadd.f32 %v288_v51, %v287_v49 }
  0x73   : > { %v577_v26 = vpop.eup %576 }
  0x74   : > { %v579_v27 = vpop.eup %578  ;;  %v246_v28 = vrot.slane %v577_v26, 4 }
  0x75   : > { %v252_v30 = vrot.slane %v579_v27, 4 }
  0x76   : > { %v247_v32 = vadd.f32 %v577_v26, %v246_v28  ;;  %v325_v28 = vld [vmem:[%s914_s19] sm:$0x1] }
  0x77   : > { %v253_v33 = vadd.f32 %v579_v27, %v252_v30 }
  0x78   : > { %v248_v35 = vrot.slane %v247_v32, 2 }
  0x79   : > { %v254_v37 = vrot.slane %v253_v33, 2 }
  0x7a   : > { %v249_v38 = vadd.f32 %v248_v35, %v247_v32 }
  0x7b   : > { %v255_v39 = vadd.f32 %v254_v37, %v253_v33 }
  0x7c   : > { %v250_v41 = vrot.slane %v249_v38, 1 }
  0x7d   : > { %v256_v43 = vrot.slane %v255_v39, 1 }
  0x7e   : > { %v251_v44 = vadd.f32 %v250_v41, %v249_v38 }
  0x7f   : > { %v257_v45 = vadd.f32 %v256_v43, %v255_v39 }
  0x80   : > { %580 = vlog2.f32 %v251_v44 }
  0x81   : > { %582 = vlog2.f32 %v257_v45 }
  0x8a   : > { %v581_v52 = vpop.eup %580 }
  0x8b   : > { %v583_v55 = vpop.eup %582  ;;  %v259_v56 = vmul.f32 0.6931472, %v581_v52 }
  0x8c   : > { %v261_v58 = vmul.f32 0.6931472, %v583_v55 }
  0x8d   : > { %v262_v60 = vadd.f32 %v259_v56, %v233_v14 }
  0x8e   : > { %v263_v62 = vadd.f32 %v261_v58, %v239_v15 }
  0x8f   : > { %v290_v1 = vsub.f32 %v262_v60, %v283_v57 }
  0x90   : > { %v291_v2 = vsub.f32 %v263_v62, %v289_v59 }
  0x91   : > { %v292_v3 = vmax.f32 %v290_v1, 0.0 }
  0x92   : > { %v293_v4 = vmax.f32 %v291_v2, 0.0 }
  0x93   : > { %vm317_vm5 = vcmp.ge.f32.partialorder %v292_v3, 0.51082563 }
  0x94   : > { %vm318_vm7 = vcmp.ge.f32.partialorder %v293_v4, 0.51082563  ;;  %vm319_vm8 = vmand %vm313_vm3, %vm317_vm5 }
  0x95   : > { %vm320_vm9 = vmand %vm314_vm4, %vm318_vm7  ;;  %v326_v5 = vsel %vm319_vm8, %v292_v3, 0.0  ;;  %v495_v6 = vsel %vm319_vm8, 1.0, %v734_v0 }
  0x96   : > { %v327_v7 = vsel %vm320_vm9, %v293_v4, 0.0  ;;  %v329_v8 = vsel %vm328_vm6, %v326_v5, 0.0  ;;  %v496_v9 = vsel %vm320_vm9, 1.0, %v734_v0  ;;  %v345_v11 = vsel %vm328_vm6, %v495_v6, 0.0 }
  0x97   : > { %v330_v10 = vsel %vm328_vm6, %v327_v7, 0.0  ;;  %v346_v12 = vsel %vm328_vm6, %v496_v9, 0.0 }
  0x98   : > { %v331_v13 = vadd.f32 %v330_v10, %v329_v8  ;;  %v347_v14 = vadd.f32 %v346_v12, %v345_v11 }
  0x9a   : > { %332 = vadd.xlane.f32.xlu0 %v331_v13 }
  0x9e   : > { %348 = vadd.xlane.f32.xlu0 %v347_v14 }
 0x127   : > { %v333_v15 = vpop.xlane.xlu0 %332 }
 0x128   : > { %v334_v16 = vrot.slane %v333_v15, 4 }
 0x12a   : > { %v335_v17 = vadd.f32 %v334_v16, %v333_v15 }
 0x12b   : > { %v349_v18 = vpop.xlane.xlu0 %348 }
 0x12c   : > { %v336_v19 = vrot.slane %v335_v17, 2  ;;  %v350_v20 = vrot.slane %v349_v18, 4 }
 0x12e   : > { %v351_v21 = vadd.f32 %v350_v20, %v349_v18  ;;  %v337_v22 = vadd.f32 %v336_v19, %v335_v17 }
 0x130   : > { %v352_v0 = vrot.slane %v351_v21, 2  ;;  %v338_v23 = vrot.slane %v337_v22, 1 }
 0x132   : > { %v353_v24 = vadd.f32 %v352_v0, %v351_v21  ;;  %v339_v25 = vadd.f32 %v338_v23, %v337_v22 }
 0x134   : > { %503 = vpush %v339_v25  ;;  %v354_v26 = vrot.slane %v353_v24, 1 }
 0x136   : > { %v355_v27 = vadd.f32 %v354_v26, %v353_v24 }
 0x138   : > { %505 = vpush %v355_v27 }
 0x165   : > { %s504_s21 = spop %503 }
 0x166   : > { %v341_v29 = vstv %s504_s21 }
 0x167   : > { %v342_v30 = vadd.f32 %v341_v29, %v325_v28 }
 0x169   : > { %343 = vst [vmem:[%s914_s19] sm:$0x1] %v342_v30  ;;  %s506_s26 = spop %505 }
 0x16a   : > { %v357_v32 = vstv %s506_s26 }
 0x16b   : > { %v358_v33 = vadd.f32 %v357_v32, %v344_v31 }
 0x16d   : > { %359 = vst [vmem:[%s914_s19 + $0x1] sm:$0x1] %v358_v33 }
 0x16e   : > { %657 = shalt.err (!%p654_p2)
}
 0x16f   : > { %s658_s15 = scalar_lea.hbm %s928_s25, 32  ;;  %s662_s5 = scalar_lea.hbm %s980_s2, 64 }
 0x170   : > { %p659_p9 = scmp.ne.s32.totalorder %s928_s25, %s658_s15  ;;  %p663_p6 = scmp.lt.u32.totalorder %s928_s25, %s980_s2 }
 0x171   : > { %p664_p13 = scmp.lt.u32.totalorder %s662_s5, %s658_s15  ;;  %p666_p8 = scmp.lt.u32.totalorder %s658_s15, %s928_s25 }
 0x172   : > { %p660_p11 = pnand %p659_p9, %p993_p0 }
 0x173   : > { %p665_p5 = por %p664_p13, %p663_p6 }
 0x174   : > { %p661_p3 = pneg %p660_p11 }
 0x175   : > { %p667_p7 = por %p666_p8, %p665_p5 }
 0x177   : > { %p668_p4 = pnand %p667_p7, %p661_p3 }
 0x179   : > { %671 = shalt.err (!%p668_p4)
}
 0x17a   : > { %511 = dma.vmem_to_hbm [thread:$0]  (%p993_p0), %s930_s20, 32, %s928_s25, %s361_s3  }
 0x17b PF: > { %s386_s19 = sand.u32 1, %s710_s9   ;;  %p994_p10 = scmp.ne.s32.totalorder %s986_s24, 0 }
 0x17c   : > { %p995_p12 = scmp.ge.s32.totalorder %s730_s14, 2  ;;  %s387_s21 = scalar_lea.sflag [#allocation4], %s386_s19 }
 0x17e   : > { %p521_p1 = pnand %p995_p12, %p994_p10 }
 0x180   : > { %705 = dma.done.wait (!%p521_p1), %s387_s21, 32  }
 0x181   : > { %707 = vsyncadd (!%p521_p1), %s387_s21, 4294967264  ;;  %s21_s14 = sadd.s32 1, %s730_s14   ;;  %s996_s9 = smov %s714_s10 }
 0x182   : > { %p18_p2 = scmp.ge.s32.totalorder %s21_s14, 4   ;;  %s997_s10 = smov %s718_s11 }
 0x183   : > { %s998_s11 = smov %s808_s23  ;;  %s999_s12 = smov %s726_s13 }
 0x184   : > { %s1000_s13 = smov %s1002_s17  ;;  %20 = sbr.rel (!%p18_p2) target bundleno = 8 (0x8), region = 90 }
 0x18b   :  { %392 = vsyncpa [#allocation3], 1 }
 0x18c   :  { %394 = vsyncpa [#allocation3 + $0x1], 1 }
 0x18d   :  { %395 = vsyncpa [#allocation6], 1 }
 0x18e   :  { %397 = vsyncpa [#allocation6 + $0x1], 1 }
 0x18f   :  { %398 = vsyncpa [#allocation4], 1 }
 0x190   :  { %400 = vsyncpa [#allocation4 + $0x1], 1 }

</bundles_post_ra>
